<compile_context>
chip_gen: v5e
topology: v5e:2x2
jax: 0.10.0
libtpu: 0.0.40
codegen_flags: <defaults>
</compile_context>

<pallas_src>
import jax
import jax.numpy as jnp
from jax.experimental import pallas as pl
from jax.experimental.pallas import tpu as pltpu


# --------------------------------------------------------------------------
# Kernel construction: direct HBM->HBM DMA copy, optionally chunked by rows.
# --------------------------------------------------------------------------
def _make_dma_copy_kernel(chunk_bounds):
    """Kernel copying one statically-sized row chunk per grid step via DMA."""

    def copy_rows(x_hbm, o_hbm, sem, start, size, whole):
        if whole:
            cp = pltpu.make_async_copy(x_hbm, o_hbm, sem)
        else:
            cp = pltpu.make_async_copy(
                x_hbm.at[pl.ds(start, size)],
                o_hbm.at[pl.ds(start, size)],
                sem,
            )
        cp.start()
        cp.wait()

    if len(chunk_bounds) == 1:
        (start, size), = chunk_bounds

        def kernel(x_hbm, o_hbm, sem):
            copy_rows(x_hbm, o_hbm, sem, start, size, whole=True)

        return kernel

    def kernel(x_hbm, o_hbm, sem):
        for i, (start, size) in enumerate(chunk_bounds):
            @pl.when(pl.program_id(0) == i)
            def _(start=start, size=size):
                copy_rows(x_hbm, o_hbm, sem, start, size, whole=False)

    return kernel


def _default_copy_chunks(rows):
    """2 chunks only where it buys concurrency (v7x: 2 TCs/chip), else 1."""
    try:
        kind = jax.devices()[0].device_kind.lower()
    except Exception:
        kind = ""
    two_cores = "v7" in kind
    return 2 if (two_cores and rows >= 2) else 1


def _row_chunks(rows, n_chunks):
    """Split `rows` into up to n_chunks contiguous, near-equal row ranges."""
    n = max(1, min(n_chunks, rows))
    base, rem = divmod(rows, n)
    bounds, start = [], 0
    for i in range(n):
        size = base + (1 if i < rem else 0)
        if size > 0:
            bounds.append((start, size))
            start += size
    return bounds


def _flatten_copy(x2, *, chunks=None):
    """Materialized copy of the flattened tensor via direct HBM->HBM DMA."""
    b, d = x2.shape
    dtype = x2.dtype
    itemsize = jnp.dtype(dtype).itemsize
    nbytes = b * d * itemsize

    n_chunks = chunks if chunks is not None else _default_copy_chunks(b)
    bounds = _row_chunks(b, n_chunks)
    kernel = _make_dma_copy_kernel(bounds)

    return pl.pallas_call(
        kernel,
        out_shape=jax.ShapeDtypeStruct((b, d), dtype),
        grid=(len(bounds),),
        in_specs=[pl.BlockSpec(memory_space=pl.ANY)],     # raw HBM ref, no auto-DMA
        out_specs=pl.BlockSpec(memory_space=pl.ANY),      # raw HBM ref, no auto-DMA
        scratch_shapes=[pltpu.SemaphoreType.DMA],
        compiler_params=pltpu.CompilerParams(
            dimension_semantics=(
                ("parallel",) if len(bounds) > 1 else ("arbitrary",)
            ),
            has_side_effects=True,
        ),
        cost_estimate=pl.CostEstimate(
            flops=0,
            transcendentals=0,
            bytes_accessed=2 * nbytes,
        ),
    )(x2)


def flatten_pallas(x, *, materialize=False):
    """Equivalent of `x.view(x.size(0), -1)`.

    Default: returns the free, contiguous row-major view (no kernel, no HBM
    traffic) — exactly torch's .view semantics. Set `materialize=True` to run
    the HBM->HBM DMA identity copy (e.g. to benchmark data movement).
    """
    b = x.shape[0]
    d = 1
    for s in x.shape[1:]:
        d *= s
    x2 = x.reshape(b, d)   # free view; identical semantics to torch .view(B, -1)
    if not materialize:
        return x2
    return _flatten_copy(x2)


if __name__ == "__main__":
    key = jax.random.PRNGKey(0)
    # Small NCHW input consistent with a conv-net feature map: B=2, C=4, H=W=16.
    x = jax.random.normal(key, (2, 4, 16, 16), dtype=jnp.float32)
    y_ref = x.reshape(x.shape[0], -1)

    # Default (recommended) path: free view, no kernel.
    y_view = jax.block_until_ready(flatten_pallas(x))

    # Kernel path: direct HBM->HBM DMA copy (device-dependent chunk count).
    y_copy = jax.block_until_ready(flatten_pallas(x, materialize=True))

    # Exercise both chunking variants explicitly (single DMA and the v7x-style
    # 2-chunk "parallel" grid) so both code paths are compiled and verified.
    x2 = x.reshape(x.shape[0], -1)
    y_copy1 = jax.block_until_ready(_flatten_copy(x2, chunks=1))
    y_copy2 = jax.block_until_ready(_flatten_copy(x2, chunks=2))

    assert y_view.shape == (2, 4 * 16 * 16), y_view.shape
    assert y_copy.shape == (2, 4 * 16 * 16), y_copy.shape
    assert y_view.dtype == x.dtype and y_copy.dtype == x.dtype
    assert bool(jnp.array_equal(y_view, y_ref))
    assert bool(jnp.array_equal(y_copy, y_ref))
    assert bool(jnp.array_equal(y_copy1, y_ref))
    assert bool(jnp.array_equal(y_copy2, y_ref))

    print("KERNEL_OK")
</pallas_src>

<mosaic_0001>
module attributes {stable_mosaic.version = 11 : i64} {
  func.func @kernel(%arg0: i32, %arg1: memref<2x1024xf32, #tpu.memory_space<any>>, %arg2: memref<2x1024xf32, #tpu.memory_space<any>>, %arg3: memref<!tpu.dma_semaphore, #tpu.memory_space<semaphore_mem>>) attributes {dimension_semantics = [#tpu.dimension_semantics<arbitrary>], iteration_bounds = array<i64: 1>, scalar_prefetch = 0 : i64, scratch_operands = 1 : i64, tpu.core_type = #tpu.core_type<tc>, window_params = [{}, {}]} {
    tpu.enqueue_dma source(%arg1 : memref<2x1024xf32, #tpu.memory_space<any>>) target(%arg2 : memref<2x1024xf32, #tpu.memory_space<any>>) target_semaphore(%arg3 : memref<!tpu.dma_semaphore, #tpu.memory_space<semaphore_mem>>)
    tpu.wait_dma2 semaphore(%arg3 : memref<!tpu.dma_semaphore, #tpu.memory_space<semaphore_mem>>) src(%arg1 : memref<2x1024xf32, #tpu.memory_space<any>>) dst(%arg2 : memref<2x1024xf32, #tpu.memory_space<any>>)
    return
  }
}

</mosaic_0001>

<bundles_post_ra>
// kernel: tpu_custom_call.1
= control target key start
LH: loop header
LB: loop body
LE: loop exit
PB: predicated region body
PF: predicated region fallthrough
CT: control target
= control target key end

     0   :  { %s33_s12 = smov [#allocation2]   ;;  %s34_s13 = smov [#allocation3]   ;;  %s52_s0 = inlined_call_operand.hbm [shape: f32[2,1024], index: 0, kind: input, shape index: {}]   ;;  %s53_s1 = inlined_call_operand.hbm [shape: f32[2,1024], index: 1, kind: output, shape index: {}]  }
   0x1   :  { %s10_s8 = sshll.u32 %s52_s0, 4  ;;  %s12_s11 = sshll.u32 %s53_s1, 4  ;;  %s11_s8 = int_to_ptr.hbm [resolvable:$true] %s10_s8  ;;  %s13_s11 = int_to_ptr.hbm [resolvable:$true] %s12_s11 }
   0x2   :  { %s35_s14 = smov 0  }
   0x3   :  { %16 = dma.general %s11_s8, 256, %s13_s11, %s33_s12, %s34_s13, [#allocation4], %s35_s14, 0  }
   0x4   :  { %31 = dma.done.wait [#allocation2], 256 }
   0x5   :  { %32 = vsyncadd [#allocation2], 4294967040 }
   0x6   :  { %21 = vsyncmov [#allocation2] }
   0x9   :  { %s22_s15 = vpop.sfrf %21 }
   0xa   :  { %p27_p0 = scmp.ne.s32.totalorder %s22_s15, 0 }
   0xc   :  { %26 = shalt.err (%p27_p0)  }

</bundles_post_ra>
